<compile_context>
chip_gen: v6e
topology: v6e:2x2x1
jax: 0.10.0
libtpu: 0.0.40
codegen_flags: <defaults>
</compile_context>

<pallas_src>
import functools

import jax
import jax.numpy as jnp
from jax.experimental import pallas as pl
from jax.experimental.pallas import tpu as pltpu

LANE = 128
SUBLANE = 8

# Per-tile VMEM budget used when sizing the batch tile, conservative across
# v5e/v6e (128 MiB physical) and v7x (64 MiB physical).
_VMEM_TILE_BUDGET = 36 << 20
_VMEM_LIMIT_CAP = 48 << 20


def _round_up(x, m):
    return (x + m - 1) // m * m


def _tile_footprint_bytes(tb, d, n1, n2, n3, weight_bytes):
    """Rough per-grid-step VMEM footprint for a (tb, d) f32 input tile."""
    in_buf = 2 * tb * d * 4            # double-buffered f32 input tile
    out_buf = 2 * tb * n3 * 2          # double-buffered bf16 output tile
    # bf16 LHS casts + f32 accumulators + bf16 copies of h1/h2.
    inter = tb * (2 * d + 6 * n1 + 6 * n2 + 6 * n3)
    return in_buf + out_buf + 2 * weight_bytes + inter


def _pick_batch_tile(batch, d, n1, n2, n3, weight_bytes):
    """Pick the batch tile:
      * big (cap 1024, multiple of 256) to amortize per-step pipeline overhead,
      * >= 2 grid steps when batch > 512 so both v7x TensorCores get work,
      * shrunk only if the per-step footprint would not fit VMEM (large D)."""
    if batch <= 512:
        tb = batch                     # single block == full array dim (legal)
    else:
        tb = min(1024, _round_up(pl.cdiv(batch, 2), 256))
    while tb > SUBLANE and _tile_footprint_bytes(
            tb, d, n1, n2, n3, weight_bytes) > _VMEM_TILE_BUDGET:
        tb = _round_up(tb // 2, SUBLANE)
    return tb


def _mlp_kernel(x_ref, w1_ref, b1_ref, w2_ref, b2_ref, w3_ref, b3_ref, o_ref):
    # Cast activations to bf16 only at the MXU boundary; accumulate in f32 and
    # keep bias-add / ReLU on the f32 accumulator (v5e's VPU has no bf16 VALU).
    x = x_ref[...].astype(jnp.bfloat16)
    h1 = jnp.dot(x, w1_ref[...], preferred_element_type=jnp.float32) + b1_ref[...]
    h1 = jnp.maximum(h1, 0.0).astype(jnp.bfloat16)
    h2 = jnp.dot(h1, w2_ref[...], preferred_element_type=jnp.float32) + b2_ref[...]
    h2 = jnp.maximum(h2, 0.0).astype(jnp.bfloat16)
    out = jnp.dot(h2, w3_ref[...], preferred_element_type=jnp.float32) + b3_ref[...]
    o_ref[...] = out.astype(o_ref.dtype)   # lane-dense (TB, 128) bf16 store


@functools.partial(jax.jit, static_argnames=("batch_tile",))
def mlp_forward(x_flat, w1, b1, w2, b2, w3, b3, *, batch_tile):
    batch, d = x_flat.shape
    n1, n2, n3 = w1.shape[1], w2.shape[1], w3.shape[1]
    grid = (pl.cdiv(batch, batch_tile),)

    weight_bytes = sum(a.size * a.dtype.itemsize
                       for a in (w1, b1, w2, b2, w3, b3))
    vmem_limit = int(min(max(
        _tile_footprint_bytes(batch_tile, d, n1, n2, n3, weight_bytes) + (8 << 20),
        16 << 20), _VMEM_LIMIT_CAP))

    def resident(shape):
        # Weights / biases: same block every grid step -> stay VMEM-resident.
        return pl.BlockSpec(shape, lambda i: (0, 0))

    flops = 2 * batch * (d * n1 + n1 * n2 + n2 * n3)
    bytes_accessed = (x_flat.size * x_flat.dtype.itemsize
                      + weight_bytes + batch * n3 * 2)

    return pl.pallas_call(
        _mlp_kernel,
        out_shape=jax.ShapeDtypeStruct((batch, n3), jnp.bfloat16),
        grid_spec=pltpu.PrefetchScalarGridSpec(
            num_scalar_prefetch=0,
            grid=grid,
            in_specs=[
                pl.BlockSpec((batch_tile, d), lambda i: (i, 0)),
                resident(w1.shape), resident(b1.shape),
                resident(w2.shape), resident(b2.shape),
                resident(w3.shape), resident(b3.shape),
            ],
            out_specs=pl.BlockSpec((batch_tile, n3), lambda i: (i, 0)),
        ),
        compiler_params=pltpu.CompilerParams(
            dimension_semantics=("parallel",),
            vmem_limit_bytes=vmem_limit,
        ),
        cost_estimate=pl.CostEstimate(
            flops=flops, transcendentals=0, bytes_accessed=bytes_accessed),
    )(x_flat, w1, b1, w2, b2, w3, b3)


def _init_linear(key, fan_in, fan_out):
    """Mimics torch.nn.Linear default init: U[-1/sqrt(fan_in), 1/sqrt(fan_in)]."""
    kw, kb = jax.random.split(key)
    bound = 1.0 / jnp.sqrt(jnp.float32(fan_in))
    # Stored as (in, out): transpose of torch's (out, in) weight layout.
    w = jax.random.uniform(kw, (fan_in, fan_out), jnp.float32, -bound, bound)
    b = jax.random.uniform(kb, (1, fan_out), jnp.float32, -bound, bound)
    return w, b


def _pad2(a, shape):
    out = jnp.zeros(shape, a.dtype)
    return out.at[: a.shape[0], : a.shape[1]].set(a)


class NetPallas:
    def __init__(self, shape, middle_size_1=256, middle_size_2=64, out_size=10,
                 key=None):
        if key is None:
            key = jax.random.PRNGKey(0)
        in_features = 1
        for s in shape[1:]:
            in_features *= s
        self.in_features = in_features
        self.out_size = out_size

        # Lane-dense padded widths.
        n1 = _round_up(middle_size_1, LANE)   # 256 -> 256
        n2 = _round_up(middle_size_2, LANE)   # 64  -> 128
        n3 = _round_up(out_size, LANE)        # 10  -> 128

        k1, k2, k3 = jax.random.split(key, 3)
        w1, b1 = _init_linear(k1, in_features, middle_size_1)
        w2, b2 = _init_linear(k2, middle_size_1, middle_size_2)
        w3, b3 = _init_linear(k3, middle_size_2, out_size)

        # Zero-padded lanes stay exactly 0 through ReLU(0*x + 0) and never leak
        # into the sliced [:, :out_size] result. Weights stored bf16 (halves the
        # weight DMA, native MXU rate); biases stay f32 for the f32 accumulator.
        self.w1 = _pad2(w1, (in_features, n1)).astype(jnp.bfloat16)
        self.b1 = _pad2(b1, (1, n1))
        self.w2 = _pad2(w2, (n1, n2)).astype(jnp.bfloat16)
        self.b2 = _pad2(b2, (1, n2))
        self.w3 = _pad2(w3, (n2, n3)).astype(jnp.bfloat16)
        self.b3 = _pad2(b3, (1, n3))

        self._weight_bytes = sum(
            a.size * a.dtype.itemsize
            for a in (self.w1, self.b1, self.w2, self.b2, self.w3, self.b3))
        # Guard the "all weights VMEM-resident" assumption: w1 scales with the
        # flattened input and breaks first on v7x's 64 MiB physical VMEM.
        if 2 * self._weight_bytes > 24 << 20:
            # TODO(synk): K-tile fc1 over an extra "arbitrary" grid axis with an
            # f32 accumulator scratch for very large flattened inputs.
            raise ValueError(
                f"resident weight footprint {2 * self._weight_bytes} B exceeds "
                "the VMEM budget; fc1 needs K-tiling for this input size")
        self._dims = (n1, n2, n3)

    def __call__(self, x):
        batch = x.shape[0]
        # NCHW -> (B, D): free for contiguous input. No padding and no dtype
        # cast here (the bf16 cast happens inside the kernel); the partial tail
        # batch block, if any, is handled by Pallas' block clamping.
        x_flat = x.reshape(batch, -1)
        n1, n2, n3 = self._dims
        # Note: batch_tile is a static jit arg, so each distinct batch size
        # retraces mlp_forward once (bucket batches upstream if that matters).
        tb = _pick_batch_tile(batch, self.in_features, n1, n2, n3,
                              self._weight_bytes)
        out = mlp_forward(x_flat, self.w1, self.b1, self.w2, self.b2,
                          self.w3, self.b3, batch_tile=tb)
        # Slice the real logits and return f32 (matches the torch module's
        # output dtype); slice + cast fuse into one tiny pass (256 B/row read).
        return out[:, : self.out_size].astype(jnp.float32)


if __name__ == "__main__":
    key = jax.random.PRNGKey(0)
    k_in, k_params = jax.random.split(key)

    # Small NCHW input consistent with the module: (B=2, C=4, H=16, W=16) -> D=1024.
    x = jax.random.normal(k_in, (2, 4, 16, 16), dtype=jnp.float32)

    net = NetPallas(shape=(2, 4, 16, 16), key=k_params)
    y = net(x)
    y = jax.block_until_ready(y)

    # Reference in plain JAX with the same bf16-operand / f32-accumulate math
    # and the same bf16 output store.
    xb = x.reshape(2, -1).astype(jnp.bfloat16)
    h1 = jnp.maximum(
        jnp.dot(xb, net.w1, preferred_element_type=jnp.float32) + net.b1, 0.0)
    h2 = jnp.maximum(
        jnp.dot(h1.astype(jnp.bfloat16), net.w2,
                preferred_element_type=jnp.float32) + net.b2, 0.0)
    full = (jnp.dot(h2.astype(jnp.bfloat16), net.w3,
                    preferred_element_type=jnp.float32) + net.b3)
    ref = full.astype(jnp.bfloat16)[:, :10].astype(jnp.float32)

    assert y.shape == (2, 10)
    assert y.dtype == jnp.float32
    assert jnp.allclose(y, ref, atol=1e-2, rtol=1e-2)

    print("KERNEL_OK")
</pallas_src>

<mosaic_0001>
module attributes {stable_mosaic.version = 11 : i64} {
  func.func @_mlp_kernel(%arg0: i32, %arg1: memref<2x1024xf32, #tpu.memory_space<vmem>>, %arg2: memref<1024x256xbf16, #tpu.memory_space<vmem>>, %arg3: memref<1x256xf32, #tpu.memory_space<vmem>>, %arg4: memref<256x128xbf16, #tpu.memory_space<vmem>>, %arg5: memref<1x128xf32, #tpu.memory_space<vmem>>, %arg6: memref<128x128xbf16, #tpu.memory_space<vmem>>, %arg7: memref<1x128xf32, #tpu.memory_space<vmem>>, %arg8: memref<2x128xbf16, #tpu.memory_space<vmem>>) attributes {dimension_semantics = [#tpu.dimension_semantics<parallel>], iteration_bounds = array<i64: 1>, scalar_prefetch = 0 : i64, scratch_operands = 0 : i64, tpu.core_type = #tpu.core_type<tc>, window_params = [{transform_indices = @transform_0, window_bounds = array<i64: 2, 1024>}, {pipeline_mode = #tpu.pipeline_mode<synchronous>, transform_indices = @transform_1, window_bounds = array<i64: 1024, 256>}, {pipeline_mode = #tpu.pipeline_mode<synchronous>, transform_indices = @transform_2, window_bounds = array<i64: 1, 256>}, {pipeline_mode = #tpu.pipeline_mode<synchronous>, transform_indices = @transform_3, window_bounds = array<i64: 256, 128>}, {pipeline_mode = #tpu.pipeline_mode<synchronous>, transform_indices = @transform_4, window_bounds = array<i64: 1, 128>}, {pipeline_mode = #tpu.pipeline_mode<synchronous>, transform_indices = @transform_5, window_bounds = array<i64: 128, 128>}, {pipeline_mode = #tpu.pipeline_mode<synchronous>, transform_indices = @transform_6, window_bounds = array<i64: 1, 128>}, {transform_indices = @transform_7, window_bounds = array<i64: 2, 128>}]} {
    %c0 = arith.constant 0 : index
    %c0_0 = arith.constant 0 : index
    %0 = vector.load %arg1[%c0, %c0_0] : memref<2x1024xf32, #tpu.memory_space<vmem>>, vector<2x1024xf32>
    %1 = arith.truncf %0 : vector<2x1024xf32> to vector<2x1024xbf16>
    %c0_1 = arith.constant 0 : index
    %c0_2 = arith.constant 0 : index
    %2 = vector.load %arg2[%c0_1, %c0_2] : memref<1024x256xbf16, #tpu.memory_space<vmem>>, vector<1024x256xbf16>
    %cst = arith.constant dense<0.000000e+00> : vector<2x256xf32>
    %3 = tpu.matmul %1, %2, %cst {dimension_numbers = #tpu.dot_dimension_numbers<[1], [0], [0], [1], [0, 0, 1, 1], [], []>} : vector<2x1024xbf16>, vector<1024x256xbf16>, vector<2x256xf32> -> vector<2x256xf32>
    %c0_3 = arith.constant 0 : index
    %c0_4 = arith.constant 0 : index
    %4 = vector.load %arg3[%c0_3, %c0_4] : memref<1x256xf32, #tpu.memory_space<vmem>>, vector<1x256xf32>
    %5 = vector.broadcast %4 : vector<1x256xf32> to vector<2x256xf32>
    %6 = arith.addf %3, %5 : vector<2x256xf32>
    %cst_5 = arith.constant 0.000000e+00 : f32
    %7 = vector.broadcast %cst_5 : f32 to vector<2x256xf32>
    %8 = arith.maximumf %6, %7 : vector<2x256xf32>
    %9 = arith.truncf %8 : vector<2x256xf32> to vector<2x256xbf16>
    %c0_6 = arith.constant 0 : index
    %c0_7 = arith.constant 0 : index
    %10 = vector.load %arg4[%c0_6, %c0_7] : memref<256x128xbf16, #tpu.memory_space<vmem>>, vector<256x128xbf16>
    %cst_8 = arith.constant dense<0.000000e+00> : vector<2x128xf32>
    %11 = tpu.matmul %9, %10, %cst_8 {dimension_numbers = #tpu.dot_dimension_numbers<[1], [0], [0], [1], [0, 0, 1, 1], [], []>} : vector<2x256xbf16>, vector<256x128xbf16>, vector<2x128xf32> -> vector<2x128xf32>
    %c0_9 = arith.constant 0 : index
    %c0_10 = arith.constant 0 : index
    %12 = vector.load %arg5[%c0_9, %c0_10] : memref<1x128xf32, #tpu.memory_space<vmem>>, vector<1x128xf32>
    %13 = vector.broadcast %12 : vector<1x128xf32> to vector<2x128xf32>
    %14 = arith.addf %11, %13 : vector<2x128xf32>
    %cst_11 = arith.constant 0.000000e+00 : f32
    %15 = vector.broadcast %cst_11 : f32 to vector<2x128xf32>
    %16 = arith.maximumf %14, %15 : vector<2x128xf32>
    %17 = arith.truncf %16 : vector<2x128xf32> to vector<2x128xbf16>
    %c0_12 = arith.constant 0 : index
    %c0_13 = arith.constant 0 : index
    %18 = vector.load %arg6[%c0_12, %c0_13] : memref<128x128xbf16, #tpu.memory_space<vmem>>, vector<128x128xbf16>
    %cst_14 = arith.constant dense<0.000000e+00> : vector<2x128xf32>
    %19 = tpu.matmul %17, %18, %cst_14 {dimension_numbers = #tpu.dot_dimension_numbers<[1], [0], [0], [1], [0, 0, 1, 1], [], []>} : vector<2x128xbf16>, vector<128x128xbf16>, vector<2x128xf32> -> vector<2x128xf32>
    %c0_15 = arith.constant 0 : index
    %c0_16 = arith.constant 0 : index
    %20 = vector.load %arg7[%c0_15, %c0_16] : memref<1x128xf32, #tpu.memory_space<vmem>>, vector<1x128xf32>
    %21 = vector.broadcast %20 : vector<1x128xf32> to vector<2x128xf32>
    %22 = arith.addf %19, %21 : vector<2x128xf32>
    %23 = arith.truncf %22 : vector<2x128xf32> to vector<2x128xbf16>
    %c0_17 = arith.constant 0 : index
    %c0_18 = arith.constant 0 : index
    %24 = vector.load %arg8[%c0_17, %c0_18] : memref<2x128xbf16, #tpu.memory_space<vmem>>, vector<2x128xbf16>
    tpu.vector_store %arg8[%c0_17, %c0_18], %23 {strides = array<i32>} : memref<2x128xbf16, #tpu.memory_space<vmem>>, vector<2x128xbf16>,
    return
  }
  func.func @transform_0(%arg0: i32) -> (i32, i32) {
    %c0_i32 = arith.constant 0 : i32
    %c0_i32_0 = arith.constant 0 : i32
    return %arg0, %c0_i32 : i32, i32
  }
  func.func @transform_1(%arg0: i32) -> (i32, i32) {
    %c0_i32 = arith.constant 0 : i32
    %c0_i32_0 = arith.constant 0 : i32
    %c0_i32_1 = arith.constant 0 : i32
    return %c0_i32, %c0_i32_0 : i32, i32
  }
  func.func @transform_2(%arg0: i32) -> (i32, i32) {
    %c0_i32 = arith.constant 0 : i32
    %c0_i32_0 = arith.constant 0 : i32
    %c0_i32_1 = arith.constant 0 : i32
    return %c0_i32, %c0_i32_0 : i32, i32
  }
  func.func @transform_3(%arg0: i32) -> (i32, i32) {
    %c0_i32 = arith.constant 0 : i32
    %c0_i32_0 = arith.constant 0 : i32
    %c0_i32_1 = arith.constant 0 : i32
    return %c0_i32, %c0_i32_0 : i32, i32
  }
  func.func @transform_4(%arg0: i32) -> (i32, i32) {
    %c0_i32 = arith.constant 0 : i32
    %c0_i32_0 = arith.constant 0 : i32
    %c0_i32_1 = arith.constant 0 : i32
    return %c0_i32, %c0_i32_0 : i32, i32
  }
  func.func @transform_5(%arg0: i32) -> (i32, i32) {
    %c0_i32 = arith.constant 0 : i32
    %c0_i32_0 = arith.constant 0 : i32
    %c0_i32_1 = arith.constant 0 : i32
    return %c0_i32, %c0_i32_0 : i32, i32
  }
  func.func @transform_6(%arg0: i32) -> (i32, i32) {
    %c0_i32 = arith.constant 0 : i32
    %c0_i32_0 = arith.constant 0 : i32
    %c0_i32_1 = arith.constant 0 : i32
    return %c0_i32, %c0_i32_0 : i32, i32
  }
  func.func @transform_7(%arg0: i32) -> (i32, i32) {
    %c0_i32 = arith.constant 0 : i32
    %c0_i32_0 = arith.constant 0 : i32
    return %arg0, %c0_i32 : i32, i32
  }
}

</mosaic_0001>

<bundles_post_ra>
// kernel: mlp_forward.1
= control target key start
LH: loop header
LB: loop body
LE: loop exit
PB: predicated region body
PF: predicated region fallthrough
CT: control target
= control target key end

     0   :  { %12 = vsyncpa [#allocation3], 0  ;;  %s2032_s0 = inlined_call_operand.hbm [shape: f32[2,1024], index: 0, kind: input, shape index: {}]   ;;  %s2033_s1 = inlined_call_operand.hbm [shape: bf16[1024,256], index: 1, kind: input, shape index: {}]   ;;  %s2034_s2 = inlined_call_operand.vmem [shape: f32[1,256], index: 2, kind: input, shape index: {}]   ;;  %s2035_s3 = inlined_call_operand.hbm [shape: bf16[256,128], index: 3, kind: input, shape index: {}]   ;;  %s2036_s4 = inlined_call_operand.vmem [shape: f32[1,128], index: 4, kind: input, shape index: {}]   ;;  %s2037_s5 = inlined_call_operand.hbm [shape: bf16[128,128], index: 5, kind: input, shape index: {}]   ;;  %s2038_s6 = inlined_call_operand.vmem [shape: f32[1,128], index: 6, kind: input, shape index: {}]   ;;  %s2039_s7 = inlined_call_operand.hbm [shape: bf16[2,128], index: 7, kind: output, shape index: {}]  }
   0x1   :  { %13 = vsyncpa [#allocation6], 0 }
   0x2   :  { %14 = vsyncpa [#allocation9], 0 }
   0x3   :  { %15 = vsyncpa [#allocation4], 0  ;;  %s1933_s24 = smov [#allocation5]  }
   0x4   :  { %s31_s25 = sshll.u32 %s1933_s24, 4  ;;  %s32_s25 = int_to_ptr.vmem [resolvable:$true] %s31_s25 }
   0x5   :  { %s1833_s26 = scalar_lea.vmem %s32_s25, 16384  ;;  %p1838_p1 = scmp.lt.s32.totalorder %s32_s25, %s32_s25 }
   0x6   :  { %p1834_p0 = scmp.ne.s32.totalorder %s32_s25, %s1833_s26  ;;  %p1839_p2 = scmp.lt.s32.totalorder %s1833_s26, %s1833_s26 }
   0x8   :  { %p1840_p3 = por %p1839_p2, %p1838_p1 }
   0xa   :  { %p1841_p4 = pnand %p1840_p3, %p1834_p0 }
   0xc   :  { %1844 = shalt.err (!%p1841_p4)
}
   0xd   :  { %s1934_s27 = smov 128   ;;  %s1935_s28 = smov 8  }
   0xe   :  { %37 = dma.hbm_to_vmem [thread:$0]  %s2033_s1, 16384, %s32_s25, [#allocation6], %s1934_s27, %s1934_s27, %s1935_s28  }
   0xf   :  { %s1936_s8 = smov [#allocation2]   ;;  %s1937_s10 = smov [#allocation7]  }
  0x10   :  { %s22_s9 = sshll.u32 %s1936_s8, 4  ;;  %s45_s11 = sshll.u32 %s1937_s10, 4  ;;  %s23_s9 = int_to_ptr.vmem [resolvable:$true] %s22_s9  ;;  %s46_s11 = int_to_ptr.vmem [resolvable:$true] %s45_s11 }
  0x11   :  { %s1853_s12 = scalar_lea.vmem %s23_s9, 256  ;;  %p1858_p6 = scmp.lt.s32.totalorder %s23_s9, %s23_s9 }
  0x12   :  { %p1854_p5 = scmp.ne.s32.totalorder %s23_s9, %s1853_s12  ;;  %p1859_p7 = scmp.lt.s32.totalorder %s1853_s12, %s1853_s12 }
  0x14   :  { %p1860_p8 = por %p1859_p7, %p1858_p6 }
  0x16   :  { %p1861_p9 = pnand %p1860_p8, %p1854_p5 }
  0x18   :  { %1864 = shalt.err (!%p1861_p9)
}
  0x19   :  { %25 = dma.hbm_to_vmem [thread:$0]  %s2032_s0, 256, %s23_s9, [#allocation3]  }
  0x1a   :  { %s1873_s15 = scalar_lea.vmem %s46_s11, 2048  ;;  %p1878_p11 = scmp.lt.s32.totalorder %s46_s11, %s46_s11 }
  0x1b   :  { %p1874_p10 = scmp.ne.s32.totalorder %s46_s11, %s1873_s15  ;;  %p1879_p12 = scmp.lt.s32.totalorder %s1873_s15, %s1873_s15 }
  0x1d   :  { %p1880_p13 = por %p1879_p12, %p1878_p11 }
  0x1f   :  { %p1881_p0 = pnand %p1880_p13, %p1874_p10 }
  0x21   :  { %1884 = shalt.err (!%p1881_p0)
}
  0x22   :  { %s1938_s1 = smov 64   ;;  %s1939_s16 = smov 4  }
  0x23   :  { %51 = dma.hbm_to_vmem [thread:$0]  %s2035_s3, 2048, %s46_s11, [#allocation6], %s1938_s1, %s1938_s1, %s1939_s16  }
  0x24   :  { %s1940_s19 = smov [#allocation8]  }
  0x25   :  { %s59_s20 = sshll.u32 %s1940_s19, 4  ;;  %s60_s20 = int_to_ptr.vmem [resolvable:$true] %s59_s20 }
  0x26   :  { %s1893_s21 = scalar_lea.vmem %s60_s20, 1024  ;;  %p1898_p2 = scmp.lt.s32.totalorder %s60_s20, %s60_s20 }
  0x27   :  { %p1894_p1 = scmp.ne.s32.totalorder %s60_s20, %s1893_s21  ;;  %p1899_p3 = scmp.lt.s32.totalorder %s1893_s21, %s1893_s21 }
  0x29   :  { %p1900_p4 = por %p1899_p3, %p1898_p2 }
  0x2b   :  { %p1901_p5 = pnand %p1900_p4, %p1894_p1 }
  0x2d   :  { %1904 = shalt.err (!%p1901_p5)
}
  0x2e   :  { %65 = dma.hbm_to_vmem [thread:$0]  %s2037_s5, 1024, %s60_s20, [#allocation9], %s1938_s1, %s1938_s1, %s1939_s16  }
  0x2f   :  { %1925 = dma.done.wait [#allocation3], 256  }
  0x30   :  { %1926 = vsyncadd [#allocation3], 4294967040 }
  0x31   :  { %1927 = dma.done.wait [#allocation6], 18432  }
  0x32   :  { %1928 = vsyncadd [#allocation6], 4294948864 }
  0x33   :  { %1929 = dma.done.wait [#allocation9], 1024  }
  0x34   :  { %1930 = vsyncadd [#allocation9], 4294966272  ;;  %v1607_v0 = vld [vmem:[#allocation5 + $0x74] ss:$8 sps:$4 sm:$0xff]   ;;  %v1611_v2 = vld [vmem:[#allocation5 + $0x70] ss:$8 sps:$4 sm:$0xff]   ;;  %v89_v38 = vlaneseq }
  0x35   :  { %v1609_v1 = vld [vmem:[#allocation5 + $0x174] ss:$8 sps:$4 sm:$0xff]   ;;  %915 = vmatprep.subr.bf16.mxu0 %v1607_v0  ;;  %v1612_v3 = vld [vmem:[#allocation5 + $0x170] ss:$8 sps:$4 sm:$0xff]   ;;  %v1613_v4 = vld [vmem:[#allocation5 + $0x64] ss:$8 sps:$4 sm:$0xff]  }
  0x36   :  { %956 = vmatprep.subr.bf16.mxu1 %v1609_v1  ;;  %916 = vmatpush1.bf16.msra.mxu0 %v1611_v2  ;;  %v1615_v5 = vld [vmem:[#allocation5 + $0x164] ss:$8 sps:$4 sm:$0xff]   ;;  %v1617_v6 = vld [vmem:[#allocation5 + $0x60] ss:$8 sps:$4 sm:$0xff]   ;;  %v1619_v8 = vld [vmem:[#allocation5 + $0x54] ss:$8 sps:$4 sm:$0xff]  }
  0x37   :  { %957 = vmatpush1.bf16.msra.mxu1 %v1612_v3  ;;  %917 = vmatprep.subr.bf16.mxu0 %v1613_v4  ;;  %v1618_v7 = vld [vmem:[#allocation5 + $0x160] ss:$8 sps:$4 sm:$0xff]   ;;  %v1621_v9 = vld [vmem:[#allocation5 + $0x154] ss:$8 sps:$4 sm:$0xff]   ;;  %v1623_v10 = vld [vmem:[#allocation5 + $0x50] ss:$8 sps:$4 sm:$0xff]  }
  0x38   :  { %958 = vmatprep.subr.bf16.mxu1 %v1615_v5  ;;  %v1624_v11 = vld [vmem:[#allocation5 + $0x150] ss:$8 sps:$4 sm:$0xff]   ;;  %v1625_v12 = vld [vmem:[#allocation5 + $0x44] ss:$8 sps:$4 sm:$0xff]   ;;  %v1629_v14 = vld [vmem:[#allocation5 + $0x40] ss:$8 sps:$4 sm:$0xff]  }
  0x39   :  { %v1627_v13 = vld [vmem:[#allocation5 + $0x144] ss:$8 sps:$4 sm:$0xff]   ;;  %v1630_v15 = vld [vmem:[#allocation5 + $0x140] ss:$8 sps:$4 sm:$0xff]   ;;  %v1631_v16 = vld [vmem:[#allocation5 + $0x34] ss:$8 sps:$4 sm:$0xff]  }
  0x3a   :  { %918 = vmatpush1.bf16.msra.mxu0 %v1617_v6  ;;  %v1633_v17 = vld [vmem:[#allocation5 + $0x134] ss:$8 sps:$4 sm:$0xff]   ;;  %v1635_v18 = vld [vmem:[#allocation5 + $0x30] ss:$8 sps:$4 sm:$0xff]   ;;  %v1637_v20 = vld [vmem:[#allocation5 + $0x24] ss:$8 sps:$4 sm:$0xff]  }
  0x3b   :  { %959 = vmatpush1.bf16.msra.mxu1 %v1618_v7  ;;  %919 = vmatprep.subr.bf16.mxu0 %v1619_v8  ;;  %v1636_v19 = vld [vmem:[#allocation5 + $0x130] ss:$8 sps:$4 sm:$0xff]   ;;  %v1639_v21 = vld [vmem:[#allocation5 + $0x124] ss:$8 sps:$4 sm:$0xff]   ;;  %v1641_v22 = vld [vmem:[#allocation5 + $0x20] ss:$8 sps:$4 sm:$0xff]  }
  0x3c   :  { %960 = vmatprep.subr.bf16.mxu1 %v1621_v9  ;;  %v1642_v23 = vld [vmem:[#allocation5 + $0x120] ss:$8 sps:$4 sm:$0xff]   ;;  %v1643_v24 = vld [vmem:[#allocation5 + $0x14] ss:$8 sps:$4 sm:$0xff]   ;;  %v1647_v26 = vld [vmem:[#allocation5 + $0x10] ss:$8 sps:$4 sm:$0xff]  }
  0x3d   :  { %v1645_v25 = vld [vmem:[#allocation5 + $0x114] ss:$8 sps:$4 sm:$0xff]   ;;  %v1648_v27 = vld [vmem:[#allocation5 + $0x110] ss:$8 sps:$4 sm:$0xff]   ;;  %v1649_v28 = vld [vmem:[#allocation5 + $0x4] ss:$8 sps:$4 sm:$0xff]  }
  0x3e   :  { %920 = vmatpush1.bf16.msra.mxu0 %v1623_v10  ;;  %v1651_v29 = vld [vmem:[#allocation5 + $0x104] ss:$8 sps:$4 sm:$0xff]   ;;  %v1653_v30 = vld [vmem:[#allocation5] ss:$8 sps:$4 sm:$0xff]   ;;  %v1655_v32 = vld [vmem:[#allocation5 + $0xf4] ss:$8 sps:$4 sm:$0xff]  }
  0x3f   :  { %961 = vmatpush1.bf16.msra.mxu1 %v1624_v11  ;;  %921 = vmatprep.subr.bf16.mxu0 %v1625_v12  ;;  %v1654_v31 = vld [vmem:[#allocation5 + $0x100] ss:$8 sps:$4 sm:$0xff]   ;;  %v1657_v33 = vld [vmem:[#allocation5 + $0x1f4] ss:$8 sps:$4 sm:$0xff]   ;;  %v1659_v34 = vld [vmem:[#allocation5 + $0xf0] ss:$8 sps:$4 sm:$0xff]  }
  0x40   :  { %962 = vmatprep.subr.bf16.mxu1 %v1627_v13  ;;  %v1660_v35 = vld [vmem:[#allocation5 + $0x1f0] ss:$8 sps:$4 sm:$0xff]   ;;  %v1941_v36 = vmov 1983009808   ;;  %v1661_v39 = vld [vmem:[#allocation5 + $0xe4] ss:$8 sps:$4 sm:$0xff]  }
  0x41   :  { %v87_v37 = vunpack.c.l.s4 %v1941_v36  ;;  %v1663_v40 = vld [vmem:[#allocation5 + $0x1e4] ss:$8 sps:$4 sm:$0xff]   ;;  %v1665_v41 = vld [vmem:[#allocation5 + $0xe0] ss:$8 sps:$4 sm:$0xff]   ;;  %v1997_v43 = vshrl.u32 %v89_v38, 7  ;;  %v81_v52 = vld [vmem:[#allocation2] sm:$0xff] }
  0x42   :  { %922 = vmatpush1.bf16.msra.mxu0 %v1629_v14  ;;  %v1666_v44 = vld [vmem:[#allocation5 + $0x1e0] ss:$8 sps:$4 sm:$0xff]   ;;  %v1667_v45 = vld [vmem:[#allocation5 + $0xd4] ss:$8 sps:$4 sm:$0xff]   ;;  %v1671_v47 = vld [vmem:[#allocation5 + $0xd0] ss:$8 sps:$4 sm:$0xff]   ;;  %v85_v55 = vcombine.high %v81_v52, %v81_v52 }
  0x43   :  { %963 = vmatpush1.bf16.msra.mxu1 %v1630_v15  ;;  %923 = vmatprep.subr.bf16.mxu0 %v1631_v16  ;;  %v88_v42 = vunpack.c.0.s8 %v87_v37  ;;  %v1669_v46 = vld [vmem:[#allocation5 + $0x1d4] ss:$8 sps:$4 sm:$0xff]   ;;  %v1672_v48 = vld [vmem:[#allocation5 + $0x1d0] ss:$8 sps:$4 sm:$0xff]   ;;  %v1673_v50 = vld [vmem:[#allocation5 + $0xc4] ss:$8 sps:$4 sm:$0xff]  }
  0x44   :  { %964 = vmatprep.subr.bf16.mxu1 %v1633_v17  ;;  %v1675_v51 = vld [vmem:[#allocation5 + $0x1c4] ss:$8 sps:$4 sm:$0xff]   ;;  %v1677_v53 = vld [vmem:[#allocation5 + $0xc0] ss:$8 sps:$4 sm:$0xff]   ;;  %v1679_v57 = vld [vmem:[#allocation5 + $0xb4] ss:$8 sps:$4 sm:$0xff]  }
  0x45   :  { %v2000_v49 = vsub.s32 %v88_v42, %v1997_v43  ;;  %v1678_v56 = vld [vmem:[#allocation5 + $0x1c0] ss:$8 sps:$4 sm:$0xff]   ;;  %v1681_v58 = vld [vmem:[#allocation5 + $0x1b4] ss:$8 sps:$4 sm:$0xff]   ;;  %v1683_v61 = vld [vmem:[#allocation5 + $0xb0] ss:$8 sps:$4 sm:$0xff]  }
  0x46   :  { %924 = vmatpush1.bf16.msra.mxu0 %v1635_v18  ;;  %v1684_v0 = vld [vmem:[#allocation5 + $0x1b0] ss:$8 sps:$4 sm:$0xff]   ;;  %v1685_v1 = vld [vmem:[#allocation5 + $0xa4] ss:$8 sps:$4 sm:$0xff]   ;;  %v1689_v4 = vld [vmem:[#allocation5 + $0xa0] ss:$8 sps:$4 sm:$0xff]  }
  0x47   :  { %965 = vmatpush1.bf16.msra.mxu1 %v1636_v19  ;;  %925 = vmatprep.subr.bf16.mxu0 %v1637_v20  ;;  %v92_v54 = vrot.slane %v81_v52, %v2000_v49  ;;  %v99_v60 = vrot.slane %v85_v55, %v2000_v49  ;;  %v1687_v2 = vld [vmem:[#allocation5 + $0x1a4] ss:$8 sps:$4 sm:$0xff]   ;;  %v1690_v5 = vld [vmem:[#allocation5 + $0x1a0] ss:$8 sps:$4 sm:$0xff]   ;;  %v1691_v6 = vld [vmem:[#allocation5 + $0x94] ss:$8 sps:$4 sm:$0xff]  }
  0x48   :  { %966 = vmatprep.subr.bf16.mxu1 %v1639_v21  ;;  %v1693_v7 = vld [vmem:[#allocation5 + $0x194] ss:$8 sps:$4 sm:$0xff]   ;;  %v1695_v8 = vld [vmem:[#allocation5 + $0x90] ss:$8 sps:$4 sm:$0xff]   ;;  %v1697_v10 = vld [vmem:[#allocation5 + $0x84] ss:$8 sps:$4 sm:$0xff]  }
  0x49   :  { %v100_v59 = vcombine.high %v92_v54, %v92_v54  ;;  %v101_v63 = vcombine.high %v99_v60, %v99_v60  ;;  %v1696_v9 = vld [vmem:[#allocation5 + $0x190] ss:$8 sps:$4 sm:$0xff]   ;;  %v1699_v11 = vld [vmem:[#allocation5 + $0x184] ss:$8 sps:$4 sm:$0xff]   ;;  %v1701_v12 = vld [vmem:[#allocation5 + $0x80] ss:$8 sps:$4 sm:$0xff]   ;;  %v127_v16 = vpack.c.bf16 %v92_v54, %v92_v54  ;;  %v129_v17 = vpack.c.bf16 %v99_v60, %v99_v60 }
  0x4a   :  { %926 = vmatpush1.bf16.msra.mxu0 %v1641_v22  ;;  %v1702_v13 = vld [vmem:[#allocation5 + $0x180] ss:$8 sps:$4 sm:$0xff]   ;;  %v1706_v14 = vld [vmem:[#allocation5 + $0x274] ss:$8 sps:$4 sm:$0xff]   ;;  %v1704_v18 = vld [vmem:[#allocation5 + $0x270] ss:$8 sps:$4 sm:$0xff]  }
  0x4b   :  { %967 = vmatpush1.bf16.msra.mxu1 %v1642_v23  ;;  %927 = vmatprep.subr.bf16.mxu0 %v1643_v24  ;;  %v128_v62 = vpack.c.bf16 %v100_v59, %v100_v59  ;;  %v130_v3 = vpack.c.bf16 %v101_v63, %v101_v63  ;;  %v1709_v15 = vld [vmem:[#allocation5 + $0x374] ss:$8 sps:$4 sm:$0xff]   ;;  %v1707_v19 = vld [vmem:[#allocation5 + $0x370] ss:$8 sps:$4 sm:$0xff]   ;;  %v1712_v20 = vld [vmem:[#allocation5 + $0x264] ss:$8 sps:$4 sm:$0xff]  }
  0x4c   :  { %968 = vmatprep.subr.bf16.mxu1 %v1645_v25  ;;  %v1715_v21 = vld [vmem:[#allocation5 + $0x364] ss:$8 sps:$4 sm:$0xff]   ;;  %v1710_v22 = vld [vmem:[#allocation5 + $0x260] ss:$8 sps:$4 sm:$0xff]   ;;  %v1718_v24 = vld [vmem:[#allocation5 + $0x254] ss:$8 sps:$4 sm:$0xff]  }
  0x4d   :  { %947 = vmatprep.mubr.bf16.mxu0 %v128_v62  ;;  %988 = vmatprep.mubr.bf16.mxu1 %v130_v3  ;;  %v1713_v23 = vld [vmem:[#allocation5 + $0x360] ss:$8 sps:$4 sm:$0xff]   ;;  %v1721_v25 = vld [vmem:[#allocation5 + $0x354] ss:$8 sps:$4 sm:$0xff]   ;;  %v1736_v36 = vld [vmem:[#allocation5 + $0x224] ss:$8 sps:$4 sm:$0xff]  }
  0x4e   :  { %928 = vmatpush1.bf16.msra.mxu0 %v1647_v26  ;;  %v1716_v26 = vld [vmem:[#allocation5 + $0x250] ss:$8 sps:$4 sm:$0xff]   ;;  %v1739_v37 = vld [vmem:[#allocation5 + $0x324] ss:$8 sps:$4 sm:$0xff]   ;;  %v1734_v38 = vld [vmem:[#allocation5 + $0x220] ss:$8 sps:$4 sm:$0xff]  }
  0x4f   :  { %969 = vmatpush1.bf16.msra.mxu1 %v1648_v27  ;;  %929 = vmatprep.subr.bf16.mxu0 %v1649_v28  ;;  %v1719_v27 = vld [vmem:[#allocation5 + $0x350] ss:$8 sps:$4 sm:$0xff]   ;;  %v1724_v28 = vld [vmem:[#allocation5 + $0x244] ss:$8 sps:$4 sm:$0xff]   ;;  %v1749_v54 = vld [vmem:[#allocation5 + $0x300] ss:$8 sps:$4 sm:$0xff]  }
  0x50   :  { %970 = vmatprep.subr.bf16.mxu1 %v1651_v29  ;;  %v1727_v29 = vld [vmem:[#allocation5 + $0x344] ss:$8 sps:$4 sm:$0xff]   ;;  %v82_v42 = vld [vmem:[#allocation2 + $0x8] sm:$0xff]  ;;  %v1758_v63 = vld [vmem:[#allocation5 + $0x2e0] ss:$8 sps:$4 sm:$0xff]   ;;  %vm1943_vm0 = vmmov 0  }
  0x51   :  { %v1752_v60 = vld [vmem:[#allocation5 + $0x2f0] ss:$8 sps:$4 sm:$0xff]   ;;  %v1763_v62 = vld [vmem:[#allocation5 + $0x3e4] ss:$8 sps:$4 sm:$0xff]   ;;  %s1944_s26 = smov [#allocation10]  }
  0x52   :  { %930 = vmatpush1.bf16.msra.mxu0 %v1653_v30  ;;  %v1722_v30 = vld [vmem:[#allocation5 + $0x240] ss:$8 sps:$4 sm:$0xff]   ;;  %v1764_v3 = vld [vmem:[#allocation5 + $0x2d0] ss:$8 sps:$4 sm:$0xff]   ;;  %s1379_s27 = sshll.u32 %s1944_s26, 4  ;;  %s1380_s27 = int_to_ptr.vmem [resolvable:$true] %s1379_s27 }
  0x53   :  { %971 = vmatpush1.bf16.msra.mxu1 %v1654_v31  ;;  %931 = vmatprep.subr.bf16.mxu0 %v1655_v32  ;;  %v1725_v31 = vld [vmem:[#allocation5 + $0x340] ss:$8 sps:$4 sm:$0xff]   ;;  %v1730_v32 = vld [vmem:[#allocation5 + $0x234] ss:$8 sps:$4 sm:$0xff]   ;;  %s1909_s28 = scalar_lea.vmem %s1380_s27, 32  ;;  %p1910_p7 = scmp.lt.s32.totalorder %s1380_s27, %s1380_s27 }
  0x54   :  { %972 = vmatprep.subr.bf16.mxu1 %v1657_v33  ;;  %v1733_v33 = vld [vmem:[#allocation5 + $0x334] ss:$8 sps:$4 sm:$0xff]  }
  0x56   :  { %932 = vmatpush2.bf16.msra.mxu0 %v1659_v34  ;;  %v1728_v34 = vld [vmem:[#allocation5 + $0x230] ss:$8 sps:$4 sm:$0xff]  }
  0x57   :  { %973 = vmatpush2.bf16.msra.mxu1 %v1660_v35  ;;  %933 = vmatprep.subr.bf16.mxu0 %v1661_v39  ;;  %v1731_v35 = vld [vmem:[#allocation5 + $0x330] ss:$8 sps:$4 sm:$0xff]   ;;  %v1737_v39 = vld [vmem:[#allocation5 + $0x320] ss:$8 sps:$4 sm:$0xff]  }
  0x58   :  { %974 = vmatprep.subr.bf16.mxu1 %v1663_v40  ;;  %v1742_v40 = vld [vmem:[#allocation5 + $0x214] ss:$8 sps:$4 sm:$0xff]  }
  0x5a   :  { %934 = vmatpush2.bf16.msra.mxu0 %v1665_v41  ;;  %v1745_v41 = vld [vmem:[#allocation5 + $0x314] ss:$8 sps:$4 sm:$0xff]  }
  0x5b   :  { %975 = vmatpush2.bf16.msra.mxu1 %v1666_v44  ;;  %935 = vmatprep.subr.bf16.mxu0 %v1667_v45  ;;  %v1740_v44 = vld [vmem:[#allocation5 + $0x210] ss:$8 sps:$4 sm:$0xff]  }
  0x5c   :  { %976 = vmatprep.subr.bf16.mxu1 %v1669_v46  ;;  %v1743_v45 = vld [vmem:[#allocation5 + $0x310] ss:$8 sps:$4 sm:$0xff]   ;;  %v2005_v46 = vrot.slane %v82_v42, %v2000_v49 }
  0x5e   :  { %936 = vmatpush2.bf16.msra.mxu0 %v1671_v47  ;;  %v102_v47 = vcombine.high %v82_v42, %v82_v42  ;;  %v1816_v42 = vld [vmem:[#allocation7] sm:$0xff]  }
  0x5f   :  { %977 = vmatpush2.bf16.msra.mxu1 %v1672_v48  ;;  %937 = vmatprep.subr.bf16.mxu0 %v1673_v50  ;;  %v1748_v48 = vld [vmem:[#allocation5 + $0x204] ss:$8 sps:$4 sm:$0xff]  }
  0x60   :  { %978 = vmatprep.subr.bf16.mxu1 %v1675_v51  ;;  %v1751_v50 = vld [vmem:[#allocation5 + $0x304] ss:$8 sps:$4 sm:$0xff]   ;;  %v117_v51 = vcombine.high %v2005_v46, %v2005_v46  ;;  %v2010_v52 = vrot.slane %v102_v47, %v2000_v49 }
  0x61   :  { %v1760_v49 = vld [vmem:[#allocation5 + $0x2e4] ss:$8 sps:$4 sm:$0xff]  }
  0x62   :  { %938 = vmatpush2.bf16.msra.mxu0 %v1677_v53  ;;  %v1746_v53 = vld [vmem:[#allocation5 + $0x200] ss:$8 sps:$4 sm:$0xff]   ;;  %v132_v55 = vpack.c.bf16 %v117_v51, %v117_v51 }
  0x63   :  { %979 = vmatpush2.bf16.msra.mxu1 %v1678_v56  ;;  %939 = vmatprep.subr.bf16.mxu0 %v1679_v57  ;;  %v118_v56 = vcombine.high %v2010_v52, %v2010_v52  ;;  %v1754_v57 = vld [vmem:[#allocation5 + $0x2f4] ss:$8 sps:$4 sm:$0xff]   ;;  %v1819_v47 = vld [vmem:[#allocation8 + $0x28] sm:$0xff]  }
  0x64   :  { %980 = vmatprep.subr.bf16.mxu1 %v1681_v58  ;;  %v1757_v58 = vld [vmem:[#allocation5 + $0x3f4] ss:$8 sps:$4 sm:$0xff]  }
  0x65   :  { %v134_v59 = vpack.c.bf16 %v118_v56, %v118_v56 }
  0x66   :  { %940 = vmatpush2.bf16.msra.mxu0 %v1683_v61  ;;  %v1755_v61 = vld [vmem:[#allocation5 + $0x3f0] ss:$8 sps:$4 sm:$0xff]  }
  0x67   :  { %981 = vmatpush2.bf16.msra.mxu1 %v1684_v0  ;;  %941 = vmatprep.subr.bf16.mxu0 %v1685_v1  ;;  %v1761_v0 = vld [vmem:[#allocation5 + $0x3e0] ss:$8 sps:$4 sm:$0xff]   ;;  %v1766_v1 = vld [vmem:[#allocation5 + $0x2d4] ss:$8 sps:$4 sm:$0xff]  }
  0x68   :  { %982 = vmatprep.subr.bf16.mxu1 %v1687_v2  ;;  %v1769_v2 = vld [vmem:[#allocation5 + $0x3d4] ss:$8 sps:$4 sm:$0xff]  }
  0x6a   :  { %942 = vmatpush2.bf16.msra.mxu0 %v1689_v4  ;;  %v1767_v4 = vld [vmem:[#allocation5 + $0x3d0] ss:$8 sps:$4 sm:$0xff]  }
  0x6b   :  { %983 = vmatpush2.bf16.msra.mxu1 %v1690_v5  ;;  %943 = vmatprep.subr.bf16.mxu0 %v1691_v6  ;;  %v1772_v5 = vld [vmem:[#allocation5 + $0x2c4] ss:$8 sps:$4 sm:$0xff]  }
  0x6c   :  { %984 = vmatprep.subr.bf16.mxu1 %v1693_v7  ;;  %v1775_v6 = vld [vmem:[#allocation5 + $0x3c4] ss:$8 sps:$4 sm:$0xff]   ;;  %v1770_v7 = vld [vmem:[#allocation5 + $0x2c0] ss:$8 sps:$4 sm:$0xff]  }
  0x6e   :  { %944 = vmatpush2.bf16.msra.mxu0 %v1695_v8  ;;  %v1773_v8 = vld [vmem:[#allocation5 + $0x3c0] ss:$8 sps:$4 sm:$0xff]  }
  0x6f   :  { %985 = vmatpush2.bf16.msra.mxu1 %v1696_v9  ;;  %945 = vmatprep.subr.bf16.mxu0 %v1697_v10  ;;  %v1778_v9 = vld [vmem:[#allocation5 + $0x2b4] ss:$8 sps:$4 sm:$0xff]  }
  0x70   :  { %986 = vmatprep.subr.bf16.mxu1 %v1699_v11  ;;  %v1781_v10 = vld [vmem:[#allocation5 + $0x3b4] ss:$8 sps:$4 sm:$0xff]   ;;  %v1776_v11 = vld [vmem:[#allocation5 + $0x2b0] ss:$8 sps:$4 sm:$0xff]  }
  0x72   :  { %946 = vmatpush2.bf16.msra.mxu0 %v1701_v12  ;;  %v1779_v12 = vld [vmem:[#allocation5 + $0x3b0] ss:$8 sps:$4 sm:$0xff]  }
  0x73   :  { %987 = vmatpush2.bf16.msra.mxu1 %v1702_v13  ;;  %997 = vmatprep.subr.bf16.mxu0 %v1706_v14  ;;  %v1784_v13 = vld [vmem:[#allocation5 + $0x2a4] ss:$8 sps:$4 sm:$0xff]  }
  0x74   :  { %1038 = vmatprep.subr.bf16.mxu1 %v1709_v15  ;;  %v1787_v14 = vld [vmem:[#allocation5 + $0x3a4] ss:$8 sps:$4 sm:$0xff]   ;;  %v1782_v15 = vld [vmem:[#allocation5 + $0x2a0] ss:$8 sps:$4 sm:$0xff]  }
  0x75   :  { %948 = vmatmul.mubr.bf16.vlgmr.msra.gmra.mxu0 %v127_v16  ;;  %v1785_v16 = vld [vmem:[#allocation5 + $0x3a0] ss:$8 sps:$4 sm:$0xff]  }
  0x76   :  { %989 = vmatmul.mubr.bf16.vlgmr.msra.gmra.mxu1 %v129_v17  ;;  %998 = vmatpush1.bf16.msra.mxu0 %v1704_v18  ;;  %v1790_v17 = vld [vmem:[#allocation5 + $0x294] ss:$8 sps:$4 sm:$0xff]  }
  0x77   :  { %1039 = vmatpush1.bf16.msra.mxu1 %v1707_v19  ;;  %999 = vmatprep.subr.bf16.mxu0 %v1712_v20  ;;  %v1793_v18 = vld [vmem:[#allocation5 + $0x394] ss:$8 sps:$4 sm:$0xff]   ;;  %v1788_v19 = vld [vmem:[#allocation5 + $0x290] ss:$8 sps:$4 sm:$0xff]  }
  0x78   :  { %1040 = vmatprep.subr.bf16.mxu1 %v1715_v21  ;;  %1029 = vmatprep.mubr.bf16.mxu0 %v132_v55  ;;  %v1791_v20 = vld [vmem:[#allocation5 + $0x390] ss:$8 sps:$4 sm:$0xff]   ;;  %v1796_v21 = vld [vmem:[#allocation5 + $0x284] ss:$8 sps:$4 sm:$0xff]  }
  0x79   :  { %1070 = vmatprep.mubr.bf16.mxu1 %v134_v59  ;;  %v267_v59 = vsub.s32 0, %v1997_v43 }
  0x7a   :  { %1000 = vmatpush1.bf16.msra.mxu0 %v1710_v22  ;;  %v1799_v22 = vld [vmem:[#allocation5 + $0x384] ss:$8 sps:$4 sm:$0xff]  }
  0x7b   :  { %1041 = vmatpush1.bf16.msra.mxu1 %v1713_v23  ;;  %1001 = vmatprep.subr.bf16.mxu0 %v1718_v24  ;;  %v1794_v23 = vld [vmem:[#allocation5 + $0x280] ss:$8 sps:$4 sm:$0xff]  }
  0x7c   :  { %1042 = vmatprep.subr.bf16.mxu1 %v1721_v25  ;;  %v1797_v24 = vld [vmem:[#allocation5 + $0x380] ss:$8 sps:$4 sm:$0xff]   ;;  %v131_v25 = vpack.c.bf16 %v2005_v46, %v2005_v46  ;;  %v1818_v46 = vld [vmem:[#allocation8 + $0x30] sm:$0xff]  }
  0x7e   :  { %1002 = vmatpush1.bf16.msra.mxu0 %v1716_v26  ;;  %v133_v26 = vpack.c.bf16 %v2010_v52, %v2010_v52 }
  0x7f   :  { %1043 = vmatpush1.bf16.msra.mxu1 %v1719_v27  ;;  %1003 = vmatprep.subr.bf16.mxu0 %v1724_v28  ;;  %v1801_v27 = vld [vmem:[#allocation7 + $0x78] sm:$0xff]  }
  0x80   :  { %1044 = vmatprep.subr.bf16.mxu1 %v1727_v29  ;;  %v1802_v28 = vld [vmem:[#allocation7 + $0x38] sm:$0xff]   ;;  %v1803_v29 = vld [vmem:[#allocation7 + $0x70] sm:$0xff]  }
  0x82   :  { %1004 = vmatpush1.bf16.msra.mxu0 %v1722_v30  ;;  %v1804_v30 = vld [vmem:[#allocation7 + $0x30] sm:$0xff]  }
  0x83   :  { %1045 = vmatpush1.bf16.msra.mxu1 %v1725_v31  ;;  %1005 = vmatprep.subr.bf16.mxu0 %v1730_v32  ;;  %v1805_v31 = vld [vmem:[#allocation7 + $0x68] sm:$0xff]  }
  0x84   :  { %1046 = vmatprep.subr.bf16.mxu1 %v1733_v33  ;;  %v1806_v32 = vld [vmem:[#allocation7 + $0x28] sm:$0xff]   ;;  %v1807_v33 = vld [vmem:[#allocation7 + $0x60] sm:$0xff]  }
  0x86   :  { %1006 = vmatpush1.bf16.msra.mxu0 %v1728_v34  ;;  %v1808_v34 = vld [vmem:[#allocation7 + $0x20] sm:$0xff]  }
  0x87   :  { %1047 = vmatpush1.bf16.msra.mxu1 %v1731_v35  ;;  %1007 = vmatprep.subr.bf16.mxu0 %v1736_v36  ;;  %v1809_v35 = vld [vmem:[#allocation7 + $0x58] sm:$0xff]  }
  0x88   :  { %1048 = vmatprep.subr.bf16.mxu1 %v1739_v37  ;;  %v1810_v36 = vld [vmem:[#allocation7 + $0x18] sm:$0xff]   ;;  %v1811_v37 = vld [vmem:[#allocation7 + $0x50] sm:$0xff]  }
  0x8a   :  { %1008 = vmatpush1.bf16.msra.mxu0 %v1734_v38  ;;  %v1812_v38 = vld [vmem:[#allocation7 + $0x10] sm:$0xff]  }
  0x8b   :  { %1049 = vmatpush1.bf16.msra.mxu1 %v1737_v39  ;;  %1009 = vmatprep.subr.bf16.mxu0 %v1742_v40  ;;  %v1813_v39 = vld [vmem:[#allocation7 + $0x48] sm:$0xff]  }
  0x8c   :  { %1050 = vmatprep.subr.bf16.mxu1 %v1745_v41  ;;  %v1814_v40 = vld [vmem:[#allocation7 + $0x8] sm:$0xff]   ;;  %v1815_v41 = vld [vmem:[#allocation7 + $0x40] sm:$0xff]  }
  0x8e   :  { %1010 = vmatpush1.bf16.msra.mxu0 %v1740_v44  ;;  %v1817_v44 = vld [vmem:[#allocation8 + $0x38] sm:$0xff]  }
  0x8f   :  { %1051 = vmatpush1.bf16.msra.mxu1 %v1743_v45  ;;  %1011 = vmatprep.subr.bf16.mxu0 %v1748_v48  ;;  %v1942_v45 = vmov 0.0   ;;  %v1820_v48 = vld [vmem:[#allocation8 + $0x20] sm:$0xff]  }
  0x90   :  { %1052 = vmatprep.subr.bf16.mxu1 %v1751_v50  ;;  %v1821_v50 = vld [vmem:[#allocation8 + $0x18] sm:$0xff]  }
  0x92   :  { %1012 = vmatpush1.bf16.msra.mxu0 %v1746_v53 }
  0x93   :  { %1053 = vmatpush1.bf16.msra.mxu1 %v1749_v54  ;;  %1013 = vmatprep.subr.bf16.mxu0 %v1754_v57 }
  0x94   :  { %1054 = vmatprep.subr.bf16.mxu1 %v1757_v58 }
  0x96   :  { %1014 = vmatpush2.bf16.msra.mxu0 %v1752_v60  ;;  %v263_v60 = vld [vmem:[%s2034_s2] sm:$0x3] }
  0x97   :  { %1055 = vmatpush2.bf16.msra.mxu1 %v1755_v61  ;;  %1015 = vmatprep.subr.bf16.mxu0 %v1760_v49  ;;  %v271_v61 = vsub.s32 1, %v1997_v43  ;;  %v268_v49 = vrot.slane %v263_v60, %v267_v59 }
  0x98   :  { %1056 = vmatprep.subr.bf16.mxu1 %v1763_v62 }
  0x99   :  { %v272_v62 = vrot.slane %v263_v60, %v271_v61 }
  0x9a   :  { %1016 = vmatpush2.bf16.msra.mxu0 %v1758_v63 }
  0x9b   :  { %1057 = vmatpush2.bf16.msra.mxu1 %v1761_v0  ;;  %1017 = vmatprep.subr.bf16.mxu0 %v1766_v1 }
  0x9c   :  { %1058 = vmatprep.subr.bf16.mxu1 %v1769_v2 }
  0x9e   :  { %1018 = vmatpush2.bf16.msra.mxu0 %v1764_v3 }
  0x9f   :  { %1059 = vmatpush2.bf16.msra.mxu1 %v1767_v4  ;;  %1019 = vmatprep.subr.bf16.mxu0 %v1772_v5 }
  0xa0   :  { %1060 = vmatprep.subr.bf16.mxu1 %v1775_v6 }
  0xa2   :  { %1020 = vmatpush2.bf16.msra.mxu0 %v1770_v7 }
  0xa3   :  { %1061 = vmatpush2.bf16.msra.mxu1 %v1773_v8  ;;  %1021 = vmatprep.subr.bf16.mxu0 %v1778_v9 }
  0xa4   :  { %1062 = vmatprep.subr.bf16.mxu1 %v1781_v10 }
  0xa6   :  { %1022 = vmatpush2.bf16.msra.mxu0 %v1776_v11 }
  0xa7   :  { %1063 = vmatpush2.bf16.msra.mxu1 %v1779_v12  ;;  %1023 = vmatprep.subr.bf16.mxu0 %v1784_v13 }
  0xa8   :  { %1064 = vmatprep.subr.bf16.mxu1 %v1787_v14 }
  0xaa   :  { %1024 = vmatpush2.bf16.msra.mxu0 %v1782_v15 }
  0xab   :  { %1065 = vmatpush2.bf16.msra.mxu1 %v1785_v16  ;;  %1025 = vmatprep.subr.bf16.mxu0 %v1790_v17 }
  0xac   :  { %1066 = vmatprep.subr.bf16.mxu1 %v1793_v18  ;;  %v1822_v18 = vld [vmem:[#allocation8 + $0x10] sm:$0xff]  }
  0xae   :  { %1026 = vmatpush2.bf16.msra.mxu0 %v1788_v19  ;;  %v1823_v19 = vld [vmem:[#allocation8 + $0x8] sm:$0xff]  }
  0xaf   :  { %1067 = vmatpush2.bf16.msra.mxu1 %v1791_v20  ;;  %1027 = vmatprep.subr.bf16.mxu0 %v1796_v21  ;;  %v1824_v20 = vld [vmem:[#allocation8] sm:$0xff]  }
  0xb0   :  { %1068 = vmatprep.subr.bf16.mxu1 %v1799_v22  ;;  %v1518_v22 = vld [vmem:[%s2036_s4] ss:$0 sm:$0xff]  ;;  %s1905_s4 = scalar_lea.vmem %s1380_s27, 16 }
  0xb1   :  { %p1906_p6 = scmp.ne.s32.totalorder %s1380_s27, %s1905_s4  ;;  %p1911_p8 = scmp.lt.s32.totalorder %s1909_s28, %s1905_s4 }
  0xb2   :  { %1028 = vmatpush2.bf16.msra.mxu0 %v1794_v23 }
  0xb3   :  { %1069 = vmatpush2.bf16.msra.mxu1 %v1797_v24  ;;  %1544 = vmatprep.subr.bf16.mxu0 %v1801_v27  ;;  %p1912_p9 = por %p1911_p8, %p1910_p7 }
  0xb4   :  { %1575 = vmatprep.subr.bf16.mxu1 %v1942_v45 }
  0xb5   :  { %1030 = vmatmul.mubr.bf16.vlgmr.msra.gmra.mxu0 %v131_v25  ;;  %p1913_p10 = pnand %p1912_p9, %p1906_p6 }
  0xb6   :  { %1071 = vmatmul.mubr.bf16.vlgmr.msra.gmra.mxu1 %v133_v26  ;;  %1545 = vmatpush3.bf16.msra.mxu0 %v1802_v28 }
  0xb7   :  { %1546 = vmatprep.subr.bf16.mxu0 %v1803_v29  ;;  %1576 = vmatpush3.bf16.msra.mxu1 %v1817_v44 }
  0xb8   :  { %1577 = vmatprep.subr.bf16.mxu1 %v1942_v45  ;;  %1591 = vmatprep.mubr.msk.bf16.mxu1 %vm1943_vm0, %v1942_v45 }
  0xba   :  { %1547 = vmatpush3.bf16.msra.mxu0 %v1804_v30  ;;  %v1535_v30 = vld [vmem:[%s2038_s6] ss:$0 sm:$0xff] }
  0xbb   :  { %1548 = vmatprep.subr.bf16.mxu0 %v1805_v31  ;;  %1578 = vmatpush3.bf16.msra.mxu1 %v1818_v46 }
  0xbc   :  { %1579 = vmatprep.subr.bf16.mxu1 %v1942_v45 }
  0xbe   :  { %1549 = vmatpush3.bf16.msra.mxu0 %v1806_v32 }
  0xbf   :  { %1550 = vmatprep.subr.bf16.mxu0 %v1807_v33  ;;  %1580 = vmatpush3.bf16.msra.mxu1 %v1819_v47 }
  0xc0   :  { %1581 = vmatprep.subr.bf16.mxu1 %v1942_v45 }
  0xc2   :  { %1551 = vmatpush3.bf16.msra.mxu0 %v1808_v34 }
  0xc3   :  { %1552 = vmatprep.subr.bf16.mxu0 %v1809_v35  ;;  %1582 = vmatpush3.bf16.msra.mxu1 %v1820_v48 }
  0xc4   :  { %1583 = vmatprep.subr.bf16.mxu1 %v1942_v45 }
  0xc6   :  { %1553 = vmatpush3.bf16.msra.mxu0 %v1810_v36 }
  0xc7   :  { %1554 = vmatprep.subr.bf16.mxu0 %v1811_v37  ;;  %1584 = vmatpush3.bf16.msra.mxu1 %v1821_v50 }
  0xc8   :  { %1585 = vmatprep.subr.bf16.mxu1 %v1942_v45 }
  0xca   :  { %1555 = vmatpush3.bf16.msra.mxu0 %v1812_v38 }
  0xcb   :  { %1556 = vmatprep.subr.bf16.mxu0 %v1813_v39  ;;  %1586 = vmatpush3.bf16.msra.mxu1 %v1822_v18 }
  0xcc   :  { %1587 = vmatprep.subr.bf16.mxu1 %v1942_v45 }
  0xce   :  { %1557 = vmatpush3.bf16.msra.mxu0 %v1814_v40 }
  0xcf   :  { %1558 = vmatprep.subr.bf16.mxu0 %v1815_v41  ;;  %1588 = vmatpush3.bf16.msra.mxu1 %v1823_v19 }
  0xd0   :  { %1589 = vmatprep.subr.bf16.mxu1 %v1942_v45 }
  0xd2   :  { %1559 = vmatpush3.bf16.msra.mxu0 %v1816_v42 }
  0xd3   :  { %1590 = vmatpush3.bf16.msra.mxu1 %v1824_v20 }
 0x135   :  { %v949_v51 = vpop.f32.mrf.mxu0 }
 0x136   :  { %v990_v52 = vpop.f32.mrf.mxu1  ;;  %v950_v63 = vadd.f32 %v949_v51, %v268_v49 }
 0x137   :  { %v951_v53 = vpop.f32.mrf.mxu0 }
 0x138   :  { %v992_v54 = vpop.f32.mrf.mxu1  ;;  %v952_v0 = vadd.f32 %v951_v53, %v272_v62  ;;  %v991_v1 = vadd.f32 %v990_v52, %v950_v63 }
 0x139   :  { %v953_v55 = vpop.f32.mrf.mxu0 }
 0x13a   :  { %v994_v56 = vpop.f32.mrf.mxu1  ;;  %v993_v4 = vadd.f32 %v992_v54, %v952_v0 }
 0x13b   :  { %v954_v57 = vpop.f32.mrf.mxu0 }
 0x13c   :  { %v995_v58 = vpop.f32.mrf.mxu1 }
 0x175   :  { %v1031_v2 = vpop.f32.mrf.mxu0 }
 0x176   :  { %v1072_v3 = vpop.f32.mrf.mxu1  ;;  %v1032_v5 = vadd.f32 %v1031_v2, %v991_v1 }
 0x177   :  { %v1033_v6 = vpop.f32.mrf.mxu0 }
 0x178   :  { %v1074_v7 = vpop.f32.mrf.mxu1  ;;  %v1073_v8 = vadd.f32 %v1072_v3, %v1032_v5  ;;  %v1034_v9 = vadd.f32 %v1033_v6, %v993_v4 }
 0x179   :  { %v1035_v10 = vpop.f32.mrf.mxu0 }
 0x17a   :  { %v1076_v11 = vpop.f32.mrf.mxu1  ;;  %v1075_v12 = vadd.f32 %v1074_v7, %v1034_v9  ;;  %v1079_v13 = vmax.f32 %v1073_v8, 0.0 }
 0x17b   :  { %v1036_v14 = vpop.f32.mrf.mxu0 }
 0x17c   :  { %v1077_v15 = vpop.f32.mrf.mxu1  ;;  %v1080_v43 = vmax.f32 %v1075_v12, 0.0  ;;  %v1081_v17 = vpack.c.bf16 %v1079_v13, %v1079_v13 }
 0x17e   :  { %v1082_v16 = vpack.c.bf16 %v1080_v43, %v1080_v43 }
 0x180   :  { %1250 = vmatprep.mubr.bf16.mxu0 %v1082_v16 }
 0x181   :  { %1251 = vmatmul.mubr.bf16.vlgmr.msra.gmra.mxu0 %v1081_v17 }
 0x241   :  { %v1560_v21 = vpop.f32.mrf.mxu0 }
 0x243   :  { %v1561_v23 = vpop.f32.mrf.mxu0 }
 0x244   :  { %v1562_v24 = vadd.f32 %v1561_v23, %v1560_v21 }
 0x245   :  { %v1563_v25 = vpop.f32.mrf.mxu0 }
 0x246   :  { %v1253_v26 = vadd.f32 %v1562_v24, %v1518_v22 }
 0x247   :  { %v1564_v27 = vpop.f32.mrf.mxu0 }
 0x248   :  { %v1258_v28 = vmax.f32 %v1253_v26, 0.0 }
 0x24a   :  { %v1259_v29 = vpack.c.bf16 %v1258_v28, %v1258_v28 }
 0x24c   :  { %1592 = vmatmul.mubr.bf16.vlgmr.msra.gmra.mxu1 %v1259_v29 }
 0x30c   :  { %v1365_v31 = vpop.f32.mrf.mxu1 }
 0x30d   :  { %v1366_v32 = vadd.f32 %v1535_v30, %v1365_v31 }
 0x30e   :  { %v1593_v33 = vpop.f32.mrf.mxu1 }
 0x30f   :  { %v1371_v34 = vpack.c.bf16 %v1366_v32, %v1366_v32 }
 0x310   :  { %v1368_v35 = vpop.f32.mrf.mxu1 }
 0x311   :  { %1372 = vst [vmem:[#allocation10] sm:$0x1] %v1371_v34 }
 0x312   :  { %v1594_v36 = vpop.f32.mrf.mxu1 }
 0x313   :  { %1916 = shalt.err (!%p1913_p10)
}
 0x314   :  { %1382 = dma.vmem_to_hbm [thread:$0]  %s1380_s27, 16, %s2039_s7, [#allocation4]  }
 0x315   :  { %1931 = dma.done.wait [#allocation4], 16  }
 0x316   :  { %1932 = vsyncadd [#allocation4], 4294967280 }
 0x317   :  { %1386 = vsyncpa [#allocation3], 1 }
 0x318   :  { %1387 = vsyncpa [#allocation6], 1 }
 0x319   :  { %1388 = vsyncpa [#allocation9], 1 }
 0x31a   :  { %1389 = vsyncpa [#allocation4], 1 }

</bundles_post_ra>
